<compile_context>
chip_gen: v7x
topology: tpu7x:2x2x1
jax: 0.10.0
libtpu: 0.0.40
codegen_flags: <defaults>
</compile_context>

<pallas_src>
import functools

import jax
import jax.numpy as jnp
from jax import lax
from jax.experimental import pallas as pl
from jax.experimental.pallas import tpu as pltpu


def bow_kernel(x_ref, w_ref, b_ref, o_ref, acc_ref, *, tk):
    # x_ref  : (TB, TK)  streamed bow-count tile (bf16 by default)
    # w_ref  : (L, V)    full weight, VMEM-resident (constant index_map)
    # b_ref  : (1, L)    f32 bias, resident
    # o_ref  : (TB, L)   f32 output tile
    # acc_ref: (TB, L)   f32 accumulator scratch
    k = pl.program_id(1)

    @pl.when(k == 0)
    def _():
        acc_ref[...] = jnp.zeros_like(acc_ref)

    # Slice the k-th vocab chunk out of the resident weight (128-aligned start).
    off = pl.multiple_of(k * tk, tk)
    w_tile = w_ref[:, pl.ds(off, tk)]                       # (L, TK)

    # (TB, TK) x (L, TK) -> (TB, L); transposed-RHS contraction, f32 accumulate.
    acc_ref[...] += lax.dot_general(
        x_ref[...], w_tile,
        dimension_numbers=(((1,), (1,)), ((), ())),
        preferred_element_type=jnp.float32)

    @pl.when(k == pl.num_programs(1) - 1)
    def _():
        logits = acc_ref[...] + b_ref[...]                  # (TB, L), f32
        # Numerically-stable log_softmax over the label axis (dim=1).
        m = jnp.max(logits, axis=-1, keepdims=True)
        z = logits - m
        lse = jnp.log(jnp.sum(jnp.exp(z), axis=-1, keepdims=True))
        o_ref[...] = (z - lse).astype(o_ref.dtype)


_VMEM_LIMIT_BYTES = 48 << 20    # explicit: > scoped default, safe on v7x's 64 MiB
_TILE_BUDGET_BYTES = 24 << 20   # in-flight (double-buffered) tile budget, headroom left


def _pick_tile(n, cap, align):
    """Largest t <= cap with n % t == 0 and t % align == 0; fallback: full n."""
    if n <= cap:
        return n
    t = (cap // align) * align
    while t >= align:
        if n % t == 0:
            return t
        t -= align
    return n


def _choose_tiles(B, V, L, itemsize):
    # Batch tile: multiple of 8, and at least 2 blocks when B >= 16 so both
    # v7x TensorCores get work on the "parallel" batch axis.
    tb_cap = 256 if B < 16 else min(256, B // 2)
    tb = B if B <= 8 else _pick_tile(B, tb_cap, 8)
    # Vocab tile: lane-aligned and big (fewer grid steps -> less per-step
    # DMA/setup overhead, closer to HBM roofline).
    tk = _pick_tile(V, 8192, 128)

    def in_flight(tb_, tk_):
        return (2 * tb_ * tk_ * itemsize      # x tile, double-buffered
                + 2 * L * V * itemsize        # resident weight (2x: conservative)
                + 4 * tb_ * L * 4             # acc scratch + output blocks
                + 2 * L * 4)                  # bias

    while in_flight(tb, tk) > _TILE_BUDGET_BYTES and tk % 256 == 0:
        tk //= 2
    while in_flight(tb, tk) > _TILE_BUDGET_BYTES and tb % 16 == 0:
        tb //= 2
    return tb, tk


def bow_classifier_forward(bow_vec, weight, bias, *, tb=None, tk=None,
                           stream_dtype=jnp.bfloat16):
    """log_softmax(bow_vec @ weight.T + bias, axis=1).

    bow_vec: (B, V) float counts; weight: (L, V) (PyTorch Linear layout);
    bias: (L,). Returns (B, L) float32.
    """
    B, V = bow_vec.shape
    L = weight.shape[0]

    # HBM-bound: stream inputs narrow; accumulate in f32 on the MXU.
    x = bow_vec.astype(stream_dtype)
    w = weight.astype(stream_dtype)
    b2 = bias.astype(jnp.float32).reshape(1, L)   # 2-D for TPU lane layout

    itemsize = jnp.dtype(stream_dtype).itemsize
    auto_tb, auto_tk = _choose_tiles(B, V, L, itemsize)
    tb = auto_tb if tb is None else tb
    tk = auto_tk if tk is None else tk
    assert B % tb == 0 and V % tk == 0, "wrapper assumes exact tiling"

    kernel = functools.partial(bow_kernel, tk=tk)

    return pl.pallas_call(
        kernel,
        out_shape=jax.ShapeDtypeStruct((B, L), jnp.float32),
        grid=(B // tb, V // tk),
        in_specs=[
            pl.BlockSpec((tb, tk), lambda i, k: (i, k)),   # bow tile (streamed)
            pl.BlockSpec((L, V), lambda i, k: (0, 0)),     # weight: resident, DMA'd once
            pl.BlockSpec((1, L), lambda i, k: (0, 0)),     # bias: resident
        ],
        out_specs=pl.BlockSpec((tb, L), lambda i, k: (i, 0)),
        scratch_shapes=[pltpu.VMEM((tb, L), jnp.float32)],
        compiler_params=pltpu.CompilerParams(
            dimension_semantics=("parallel", "arbitrary"),
            vmem_limit_bytes=_VMEM_LIMIT_BYTES),
    )(x, w, b2)


if __name__ == "__main__":
    # Small shapes consistent with the module: batch=32, vocab=1024, labels=8.
    B, VOCAB, NUM_LABELS = 32, 1024, 8

    key = jax.random.PRNGKey(0)
    kx, kw, kb = jax.random.split(key, 3)

    # Deterministic PyTorch-style Linear init: U(-1/sqrt(V), 1/sqrt(V))
    bound = 1.0 / (VOCAB ** 0.5)
    weight = jax.random.uniform(kw, (NUM_LABELS, VOCAB), jnp.float32,
                                minval=-bound, maxval=bound)
    bias = jax.random.uniform(kb, (NUM_LABELS,), jnp.float32,
                              minval=-bound, maxval=bound)

    # Bag-of-words counts: non-negative integers cast to float.
    bow_vec = jax.random.randint(kx, (B, VOCAB), 0, 4).astype(jnp.float32)

    # Force small-ish tiles so this run exercises the multi-step V reduction
    # (accumulator init/finalize) and >= 2 parallel batch blocks.
    out = bow_classifier_forward(bow_vec, weight, bias, tb=16, tk=256)
    out = jax.block_until_ready(out)

    # Reference on the same bf16-quantized inputs (the kernel streams bf16;
    # this checks the kernel math, not the quantization choice).
    x32 = bow_vec.astype(jnp.bfloat16).astype(jnp.float32)
    w32 = weight.astype(jnp.bfloat16).astype(jnp.float32)
    logits = jnp.dot(x32, w32.T, precision=lax.Precision.HIGHEST) + bias
    ref = jax.nn.log_softmax(logits, axis=1)

    assert out.shape == (B, NUM_LABELS)
    assert jnp.allclose(out, ref, atol=1e-4, rtol=1e-4), (
        float(jnp.max(jnp.abs(out - ref))))

    print("KERNEL_OK")
</pallas_src>

<mosaic_0001>
module attributes {stable_mosaic.version = 11 : i64} {
  func.func @bow_kernel(%arg0: i32, %arg1: i32, %arg2: memref<16x256xbf16, #tpu.memory_space<vmem>>, %arg3: memref<8x1024xbf16, #tpu.memory_space<vmem>>, %arg4: memref<1x8xf32, #tpu.memory_space<vmem>>, %arg5: memref<16x8xf32, #tpu.memory_space<vmem>>, %arg6: memref<16x8xf32, #tpu.memory_space<vmem>>) attributes {dimension_semantics = [#tpu.dimension_semantics<parallel>, #tpu.dimension_semantics<arbitrary>], iteration_bounds = array<i64: 2, 4>, scalar_prefetch = 0 : i64, scratch_operands = 1 : i64, tpu.core_type = #tpu.core_type<tc>, window_params = [{transform_indices = @transform_0, window_bounds = array<i64: 16, 256>}, {pipeline_mode = #tpu.pipeline_mode<synchronous>, transform_indices = @transform_1, window_bounds = array<i64: 8, 1024>}, {pipeline_mode = #tpu.pipeline_mode<synchronous>, transform_indices = @transform_2, window_bounds = array<i64: 1, 8>}, {transform_indices = @transform_3, window_bounds = array<i64: 16, 8>}]} {
    %c0_i32 = arith.constant 0 : i32
    %0 = arith.cmpi eq, %arg1, %c0_i32 : i32
    %1 = arith.extui %0 : i1 to i32
    %c0_i32_0 = arith.constant 0 : i32
    %2 = arith.cmpi ne, %1, %c0_i32_0 : i32
    scf.if %2 {
      %cst_8 = arith.constant 0.000000e+00 : f32
      %15 = vector.broadcast %cst_8 : f32 to vector<16x8xf32>
      %c0_9 = arith.constant 0 : index
      %c0_10 = arith.constant 0 : index
      %16 = vector.load %arg6[%c0_9, %c0_10] : memref<16x8xf32, #tpu.memory_space<vmem>>, vector<16x8xf32>
      tpu.vector_store %arg6[%c0_9, %c0_10], %15 {strides = array<i32>} : memref<16x8xf32, #tpu.memory_space<vmem>>, vector<16x8xf32>,
    } else {
    }
    %c256_i32 = arith.constant 256 : i32
    %3 = arith.muli %arg1, %c256_i32 : i32
    %4 = tpu.assume_multiple %3, 256 : i32
    %c0 = arith.constant 0 : index
    %5 = arith.index_cast %4 : i32 to index
    %6 = vector.load %arg3[%c0, %5] : memref<8x1024xbf16, #tpu.memory_space<vmem>>, vector<8x256xbf16>
    %c0_1 = arith.constant 0 : index
    %c0_2 = arith.constant 0 : index
    %7 = vector.load %arg6[%c0_1, %c0_2] : memref<16x8xf32, #tpu.memory_space<vmem>>, vector<16x8xf32>
    %c0_3 = arith.constant 0 : index
    %c0_4 = arith.constant 0 : index
    %8 = vector.load %arg2[%c0_3, %c0_4] : memref<16x256xbf16, #tpu.memory_space<vmem>>, vector<16x256xbf16>
    %cst = arith.constant dense<0.000000e+00> : vector<16x8xf32>
    %9 = tpu.matmul %8, %6, %cst {dimension_numbers = #tpu.dot_dimension_numbers<[1], [1], [0], [0], [0, 0, 1, 0], [], []>} : vector<16x256xbf16>, vector<8x256xbf16>, vector<16x8xf32> -> vector<16x8xf32>
    %10 = arith.addf %7, %9 : vector<16x8xf32>
    %c0_5 = arith.constant 0 : index
    %c0_6 = arith.constant 0 : index
    %11 = vector.load %arg6[%c0_5, %c0_6] : memref<16x8xf32, #tpu.memory_space<vmem>>, vector<16x8xf32>
    tpu.vector_store %arg6[%c0_5, %c0_6], %10 {strides = array<i32>} : memref<16x8xf32, #tpu.memory_space<vmem>>, vector<16x8xf32>,
    %c3_i32 = arith.constant 3 : i32
    %12 = arith.cmpi eq, %arg1, %c3_i32 : i32
    %13 = arith.extui %12 : i1 to i32
    %c0_i32_7 = arith.constant 0 : i32
    %14 = arith.cmpi ne, %13, %c0_i32_7 : i32
    scf.if %14 {
      %c0_8 = arith.constant 0 : index
      %c0_9 = arith.constant 0 : index
      %15 = vector.load %arg6[%c0_8, %c0_9] : memref<16x8xf32, #tpu.memory_space<vmem>>, vector<16x8xf32>
      %c0_10 = arith.constant 0 : index
      %c0_11 = arith.constant 0 : index
      %16 = vector.load %arg4[%c0_10, %c0_11] : memref<1x8xf32, #tpu.memory_space<vmem>>, vector<1x8xf32>
      %17 = vector.broadcast %16 : vector<1x8xf32> to vector<16x8xf32>
      %18 = arith.addf %15, %17 : vector<16x8xf32>
      %cst_12 = arith.constant dense<0xFF800000> : vector<16xf32>
      %19 = vector.multi_reduction <maximumf>, %18, %cst_12 [1] : vector<16x8xf32> to vector<16xf32>
      %20 = vector.shape_cast %19 : vector<16xf32> to vector<16x1xf32>
      %21 = vector.broadcast %20 : vector<16x1xf32> to vector<16x8xf32>
      %22 = arith.subf %18, %21 : vector<16x8xf32>
      %23 = math.exp %22 : vector<16x8xf32>
      %cst_13 = arith.constant dense<0.000000e+00> : vector<16xf32>
      %24 = vector.multi_reduction <add>, %23, %cst_13 [1] : vector<16x8xf32> to vector<16xf32>
      %25 = vector.shape_cast %24 : vector<16xf32> to vector<16x1xf32>
      %26 = math.log %25 : vector<16x1xf32>
      %27 = vector.broadcast %26 : vector<16x1xf32> to vector<16x8xf32>
      %28 = arith.subf %22, %27 : vector<16x8xf32>
      %c0_14 = arith.constant 0 : index
      %c0_15 = arith.constant 0 : index
      %29 = vector.load %arg5[%c0_14, %c0_15] : memref<16x8xf32, #tpu.memory_space<vmem>>, vector<16x8xf32>
      tpu.vector_store %arg5[%c0_14, %c0_15], %28 {strides = array<i32>} : memref<16x8xf32, #tpu.memory_space<vmem>>, vector<16x8xf32>,
    } else {
    }
    return
  }
  func.func @transform_0(%arg0: i32, %arg1: i32) -> (i32, i32) {
    %c0_i32 = arith.constant 0 : i32
    return %arg0, %arg1 : i32, i32
  }
  func.func @transform_1(%arg0: i32, %arg1: i32) -> (i32, i32) {
    %c0_i32 = arith.constant 0 : i32
    %c0_i32_0 = arith.constant 0 : i32
    %c0_i32_1 = arith.constant 0 : i32
    return %c0_i32, %c0_i32_0 : i32, i32
  }
  func.func @transform_2(%arg0: i32, %arg1: i32) -> (i32, i32) {
    %c0_i32 = arith.constant 0 : i32
    %c0_i32_0 = arith.constant 0 : i32
    %c0_i32_1 = arith.constant 0 : i32
    return %c0_i32, %c0_i32_0 : i32, i32
  }
  func.func @transform_3(%arg0: i32, %arg1: i32) -> (i32, i32) {
    %c0_i32 = arith.constant 0 : i32
    %c0_i32_0 = arith.constant 0 : i32
    return %arg0, %c0_i32 : i32, i32
  }
}

</mosaic_0001>

<bundles_post_ra>
// kernel: tpu_custom_call.1
= control target key start
LH: loop header
LB: loop body
LE: loop exit
PB: predicated region body
PF: predicated region fallthrough
CT: control target
= control target key end

     0   :  { %s925_s0 = inlined_call_operand.hbm [shape: bf16[32,1024], index: 0, kind: input, shape index: {}]   ;;  %s926_s1 = inlined_call_operand.hbm [shape: bf16[8,1024], index: 1, kind: input, shape index: {}]   ;;  %s927_s2 = inlined_call_operand.vmem [shape: f32[1,8], index: 2, kind: input, shape index: {}]   ;;  %s928_s3 = inlined_call_operand.vmem [shape: f32[32,8], index: 3, kind: output, shape index: {}]  }
   0x1   :  { %934 = sst [smem:[#allocation9_spill]] %s926_s1 }
   0x2   :  { %8 = vsyncpa [#allocation4], 0 }
   0x3   :  { %10 = vsyncpa [#allocation4 + $0x1], 0 }
   0x4   :  { %11 = vsyncpa [#allocation6], 0  ;;  %s722_s12 = smov 0   ;;  %s724_s13 = smov 0  }
   0x5   :  { %s726_s14 = smov 0   ;;  %s728_s15 = smov 0  }
   0x6   :  { %s730_s16 = smov 0   ;;  %s732_s17 = smov 0  }
   0x7   :  { %s734_s18 = smov 0   ;;  %s736_s19 = smov 0  }
   0x8 LB: > { %s440_s20 = sadd.s32 4294967295, %s694_s19   ;;  %p45_p0 = scmp.ne.s32.totalorder %s674_s14, %s670_s13  ;;  %s694_s19 = sphi %s736_s19, %s17_s19   ;;  %s690_s18 = sphi %s734_s18, %s953_s18   ;;  %s686_s17 = sphi %s732_s17, %s952_s17   ;;  %s682_s16 = sphi %s730_s16, %s951_s16   ;;  %s678_s15 = sphi %s728_s15, %s950_s15   ;;  %s674_s14 = sphi %s726_s14, %s949_s14   ;;  %s670_s13 = sphi %s724_s13, %s948_s13   ;;  %s666_s12 = sphi %s722_s12, %s947_s12  }
   0x9   : > { %p46_p1 = scmp.eq.s32.totalorder %s694_s19, 0  ;;  %p51_p2 = scmp.ne.s32.totalorder %s670_s13, %s666_s12 }
   0xa   : > { %p766_p3 = scmp.eq.s32.totalorder %s440_s20, 0  ;;  %p442_p5 = scmp.ge.s32.totalorder %s694_s19, 1 }
   0xb   : > { %p47_p4 = por %p46_p1, %p45_p0  ;;  %p130_p7 = scmp.lt.s32.totalorder %s694_s19, 9 }
   0xc   : > { %s935_s22 = scalar_select %p766_p3, 1, 0 }
   0xd   : > { %p773_p6 = por %p766_p3, %p51_p2  ;;  %p778_p8 = pnand %p442_p5, %p130_p7 }
   0xe   : > { %s696_s25 = smov [#allocation5]   ;;  %p482_p10 = scmp.lt.s32.totalorder %s694_s19, 8 }
   0xf   : > { %s936_s23 = scalar_select %p773_p6, 1, 0 }
  0x10   : > { %s937_s24 = scalar_select %p778_p8, 1, 0 }
  0x11   : > { %s143_s26 = sshll.u32 %s696_s25, 4  ;;  %p473_p9 = pneg %p778_p8  ;;  %s144_s26 = int_to_ptr.vmem [resolvable:$true] %s143_s26 }
  0x12   : > { %p791_p12 = pnand %p482_p10, %p47_p4  ;;  %s940_s1 = sld [smem:[#allocation9_spill]] }
  0x13   : > { %p787_p11 = pnand %p473_p9, %p766_p3 }
  0x14   : > { %s939_s28 = scalar_select %p791_p12, 1, 0 }
  0x15   : > { %p568_p0 = pneg %p787_p11 }
  0x18   : > { %s566_s4 = scalar_lea.hbm %s940_s1, 512 }
  0x19   : > { %p567_p13 = scmp.ne.s32.totalorder %s940_s1, %s566_s4  ;;  %p573_p5 = scmp.lt.u32.totalorder %s566_s4, %s940_s1 }
  0x1b   : > { %p569_p1 = pnand %p568_p0, %p567_p13 }
  0x1d   : > { %p570_p2 = pneg %p569_p1 }
  0x1f   : > { %p575_p4 = pnand %p573_p5, %p570_p2 }
  0x21   : > { %578 = shalt.err (!%p575_p4)
}
  0x22   : > { %s579_s9 = scalar_lea.vmem %s144_s26, 512  ;;  %p587_p3 = scmp.lt.s32.totalorder %s144_s26, %s144_s26 }
  0x23   : > { %p580_p7 = scmp.ne.s32.totalorder %s144_s26, %s579_s9  ;;  %p588_p6 = scmp.lt.s32.totalorder %s579_s9, %s579_s9 }
  0x25   : > { %p582_p9 = pnand %p580_p7, %p568_p0  ;;  %p589_p8 = por %p588_p6, %p587_p3 }
  0x27   : > { %p583_p10 = pneg %p582_p9 }
  0x29   : > { %p590_p12 = pnand %p589_p8, %p583_p10 }
  0x2b   : > { %593 = shalt.err (!%p590_p12)
}
  0x2c   : > { %476 = dma.hbm_to_vmem [thread:$0]  (!%p787_p11), %s940_s1, 512, %s144_s26, [#allocation6]  }
  0x2d   : > { %s26_s12 = sadd.s32 1, %s686_s17  ;;  %s29_s20 = sadd.s32 1, %s690_s18 }
  0x2e   : > { %p27_p13 = scmp.ge.s32.totalorder %s26_s12, 4  ;;  %s157_s25 = sand.u32 1, %s674_s14  }
  0x2f   : > { %s445_s29 = sshll.u32 %s157_s25, 4  ;;  %s447_s30 = sshll.u32 %s686_s17, 1 }
  0x30   : > { %s955_s12 = smov (%p27_p13, %s26_s12), 0  ;;  %s957_s20 = smov (!%p27_p13, %s29_s20), %s690_s18 }
  0x31   : > { %s34_s27 = ssub.s32 %s686_s17, %s955_s12  ;;  %p31_p3 = scmp.ge.s32.totalorder %s957_s20, 2 }
  0x32   : > { %s466_s4 = sshll.u32 %s690_s18, 4  ;;  %s161_s5 = scalar_lea.vmem [#allocation3], %s445_s29 }
  0x33   : > { %s171_s26 = sshll.u32 %s161_s5, 4  ;;  %s959_s20 = smov (%p31_p3, %s957_s20), 0  ;;  %s823_s26 = int_to_ptr.vmem [resolvable:$true] %s171_s26 }
  0x34   : > { %s168_s6 = sadd.s32 %s466_s4, %s447_s30  ;;  %s33_s7 = ssub.s32 %s690_s18, %s959_s20 }
  0x35   : > { %s449_s8 = sshll.u32 %s168_s6, 6  ;;  %s35_s9 = sor.u32 %s34_s27, %s33_s7 }
  0x36   : > { %s830_s21 = scalar_lea.hbm %s925_s0, %s449_s8  ;;  %p36_p6 = scmp.eq.s32.totalorder %s35_s9, 0 }
  0x37   : > { %s941_s29 = sadd.s32 1, %s674_s14  ;;  %s837_s1 = scalar_lea.sflag [#allocation4], %s157_s25 }
  0x38   : > { %s835_s5 = scalar_select %p36_p6, %s674_s14, %s941_s29  }
  0x39   : > { %s594_s30 = scalar_lea.hbm %s830_s21, 256  ;;  %p942_p11 = scmp.ne.s32.totalorder %s939_s28, 0 }
  0x3a   : > { %p595_p8 = scmp.ne.s32.totalorder %s830_s21, %s594_s30  ;;  %s599_s6 = scalar_lea.hbm %s925_s0, 2048 }
  0x3b   : > { %p596_p12 = pneg %p942_p11  ;;  %p600_p2 = scmp.lt.u32.totalorder %s830_s21, %s925_s0 }
  0x3c   : > { %p601_p5 = scmp.lt.u32.totalorder %s599_s6, %s594_s30  ;;  %p603_p7 = scmp.lt.u32.totalorder %s594_s30, %s830_s21 }
  0x3d   : > { %p597_p0 = pnand %p596_p12, %p595_p8 }
  0x3e   : > { %p602_p4 = por %p601_p5, %p600_p2 }
  0x3f   : > { %p598_p1 = pneg %p597_p0 }
  0x40   : > { %p604_p9 = por %p603_p7, %p602_p4 }
  0x42   : > { %p605_p10 = pnand %p604_p9, %p598_p1 }
  0x44   : > { %608 = shalt.err (!%p605_p10)
}
  0x45   : > { %s609_s25 = scalar_lea.vmem %s823_s26, 256  ;;  %s697_s9 = smov [#allocation3]  }
  0x46   : > { %p610_p13 = scmp.ne.s32.totalorder %s823_s26, %s609_s25  ;;  %s614_s10 = sshll.u32 %s697_s9, 4  ;;  %s615_s10 = int_to_ptr.vmem [resolvable:$false] %s614_s10 }
  0x47   : > { %s616_s11 = scalar_lea.vmem %s615_s10, 512  ;;  %p617_p8 = scmp.lt.s32.totalorder %s823_s26, %s615_s10 }
  0x48   : > { %p612_p3 = pnand %p610_p13, %p596_p12  ;;  %p618_p0 = scmp.lt.s32.totalorder %s616_s11, %s609_s25 }
  0x4a   : > { %p613_p6 = pneg %p612_p3  ;;  %p619_p2 = por %p618_p0, %p617_p8 }
  0x4c   : > { %p620_p5 = pnand %p619_p2, %p613_p6 }
  0x4e   : > { %623 = shalt.err (!%p620_p5)
}
  0x4f   : > { %s698_s29 = smov 512   ;;  %s699_s30 = smov 128  }
  0x50   : > { %s700_s27 = smov 8   ;;  %p943_p12 = scmp.ne.s32.totalorder %s937_s24, 0 }
  0x51   : > { %480 = dma.hbm_to_vmem [thread:$0]  (!%p942_p11), %s830_s21, 256, %s823_s26, %s837_s1, %s698_s29, %s699_s30, %s700_s27  }
  0x52   : > { %183 = sbr.rel (%p943_p12) target bundleno = 662 (0x296), region = 32  ;;  %s185_s4 = sand.u32 (!%p943_p12), 1, %s670_s13  }
  0x53   : > { %s868_s6 = sshll.u32 (!%p943_p12), %s185_s4, 4  ;;  %s186_s7 = scalar_lea.sflag (!%p943_p12), [#allocation4], %s185_s4 }
  0x54   : > { %s189_s8 = scalar_lea.vmem (!%p943_p12), [#allocation3], %s868_s6  ;;  %p944_p1 = scmp.ne.s32.totalorder (!%p943_p12), %s936_s23, 0 }
  0x59   : > { %657 = dma.done.wait (%p944_p1), %s186_s7, 256  }
  0x5a   : > { %659 = vsyncadd (%p944_p1), %s186_s7, 4294967040  ;;  %p945_p4 = scmp.ne.s32.totalorder %s935_s22, 0 }
  0x5c   : > { %661 = dma.done.wait (%p945_p4), [#allocation6], 512  }
  0x5d   : > { %663 = vsyncadd (%p945_p4), [#allocation6], 4294966784  ;;  %s453_s1 = sshll.u32 %s682_s16, 1  ;;  %p455_p7 = scmp.ne.s32.totalorder %s678_s15, 0 }
  0x5e   : > { %p219_p11 = scmp.lt.s32.totalorder %s453_s1, 3  ;;  %vm229_vm0 = vcmask (!%p455_p7), 64512   ;;  %v701_v0 = vmov (!%p455_p7), 0.0  }
  0x5f   : > { %228 = sbr.rel (%p455_p7) target bundleno = 102 (0x66), region = 44  ;;  %230 = vst.msk [vmem:[#allocation2] sm:$0xff] (!%p455_p7), %vm229_vm0, %v701_v0  ;;  %231 = vst.msk [vmem:[#allocation2 + $0x8] sm:$0xff] (!%p455_p7), %vm229_vm0, %v701_v0 }
  0x60   : > { %s961_s1 = smov (!%p219_p11, %s453_s1), 3 }
  0x61   : > { %s454_s21 = sshll.u32 %s961_s1, 3 }
  0x62   : > { %s883_s26 = scalar_lea.vmem %s928_s3, %s454_s21 }
  0x66 PF: > { %s456_s22 = sshll.u32 %s678_s15, 8  ;;  %v557_v1 = vld [vmem:[%s189_s8 + $0x4] ss:$8 sps:$4 sm:$0xff]   ;;  %v555_v5 = vld [vmem:[%s189_s8] ss:$8 sps:$4 sm:$0xff]   ;;  %vm302_vm1 = vcmask 64512  }
  0x67   : > { %s233_s23 = sshra.s32 %s456_s22, 7  ;;  %291 = vmatprep.mubr.bf16.mxu0 %v557_v1  ;;  %v238_v6 = vld [vmem:[#allocation2] sm:$0xff]  ;;  %v239_v8 = vld [vmem:[#allocation2 + $0x8] sm:$0xff]  ;;  %p462_p9 = scmp.ne.s32.totalorder %s678_s15, 3 }
  0x68   : > { %s457_s16 = sshll.u32 %s233_s23, 2  ;;  %v463_v15 = vld [vmem:[%s927_s2] ss:$0 sm:$0xff] (!%p462_p9) }
  0x69   : > { %s236_s25 = scalar_lea.vmem [#allocation5], %s457_s16 }
  0x6a   : > { %v237_v2 = vld [vmem:[%s236_s25] sm:$0xff] }
  0x6b   : > { %v461_v3 = vcombine.high %v237_v2, %v237_v2  ;;  %v460_v4 = vcombine.low %v237_v2, %v237_v2 }
  0x6d   : > { %259 = vmatprep.subr.bf16.mxu0 %v461_v3 }
  0x6e   : > { %260 = vmatpush1.bf16.xpose.msra.mxu0 %v460_v4 }
  0x75   : > { %292 = vmatmul.mubr.bf16.vlgmr.msra.gmra.mrb[0].mxu0 %v555_v5 }
 0x147   : > { %308 = sbr.rel (%p462_p9) target bundleno = 662 (0x296), region = 48 }
 0x148   : > { %v293_v7 = vpop.f32.mrb[0].mxu0 }
 0x149   : > { %v300_v9 = vadd.f32 %v293_v7, %v238_v6  ;;  %v295_v10 = vpop.f32.mrb[1].mxu0 }
 0x14a   : > { %v296_v11 = vpop.f32.mrb[2].mxu0 }
 0x14b   : > { %303 = vst.msk [vmem:[#allocation2] sm:$0xff] %vm302_vm1, %v300_v9  ;;  %v301_v12 = vadd.f32 %v296_v11, %v239_v8  ;;  %v298_v13 = vpop.f32.mrb[3].mxu0 }
 0x14d   : > { %304 = vst.msk [vmem:[#allocation2 + $0x8] sm:$0xff] %vm302_vm1, %v301_v12 }
 0x152   : > { %v309_v14 = vld [vmem:[#allocation2] sm:$0xff] }
 0x153   : > { %v318_v17 = vadd.f32 %v463_v15, %v309_v14 }
 0x154   : > { %v310_v16 = vld [vmem:[#allocation2 + $0x8] sm:$0xff] }
 0x155   : > { %v319_v18 = vadd.f32 %v463_v15, %v310_v16  ;;  %v320_v19 = vsel %vm302_vm1, %v318_v17, -inf }
 0x156   : > { %321 = vmax.xlane.f32.xlu0 %v320_v19 }
 0x157   : > { %v323_v20 = vsel %vm302_vm1, %v319_v18, -inf }
 0x15a   : > { %324 = vmax.xlane.f32.xlu0 %v323_v20 }
 0x1e3   : > { %v322_v21 = vpop.xlane.xlu0 %321 }
 0x1e4   : > { %v326_v22 = vsub.f32 %v318_v17, %v322_v21 }
 0x1e6   : > { %v328_v23 = vmul.f32 1.442695, %v326_v22 }
 0x1e7   : > { %v325_v24 = vpop.xlane.xlu0 %324 }
 0x1e8   : > { %v327_v25 = vsub.f32 %v319_v18, %v325_v24  ;;  %558 = vpow2.f32 %v328_v23 }
 0x1ea   : > { %v330_v26 = vmul.f32 1.442695, %v327_v25 }
 0x1ec   : > { %560 = vpow2.f32 %v330_v26 }
 0x1f2   : > { %v559_v27 = vpop.eup %558 }
 0x1f3   : > { %v332_v28 = vsel %vm302_vm1, %v559_v27, 0.0 }
 0x1f4   : > { %333 = vadd.xlane.f32.xlu1 %v332_v28 }
 0x1f6   : > { %v561_v29 = vpop.eup %560 }
 0x1f7   : > { %v335_v30 = vsel %vm302_vm1, %v561_v29, 0.0 }
 0x1f8   : > { %336 = vadd.xlane.f32.xlu1 %v335_v30 }
 0x281   : > { %v334_v31 = vpop.xlane.xlu1 %333 }
 0x282   : > { %562 = vlog2.f32 %v334_v31 }
 0x285   : > { %v337_v32 = vpop.xlane.xlu1 %336 }
 0x286   : > { %564 = vlog2.f32 %v337_v32 }
 0x28c   : > { %v563_v33 = vpop.eup %562 }
 0x28d   : > { %v339_v34 = vmul.f32 0.6931472, %v563_v33 }
 0x28f   : > { %v342_v35 = vsub.f32 %v326_v22, %v339_v34 }
 0x290   : > { %v565_v36 = vpop.eup %564 }
 0x291   : > { %344 = vst.msk [vmem:[%s883_s26] sm:$0xff] %vm302_vm1, %v342_v35  ;;  %v341_v37 = vmul.f32 0.6931472, %v565_v36 }
 0x293   : > { %v343_v38 = vsub.f32 %v327_v25, %v341_v37 }
 0x295   : > { %345 = vst.msk [vmem:[%s883_s26 + $0x8] sm:$0xff] %vm302_vm1, %v343_v38 }
 0x296 PF: > { %s17_s19 = sadd.s32 1, %s694_s19   ;;  %s946_s11 = smov %s955_s12 }
 0x297   : > { %p14_p10 = scmp.ge.s32.totalorder %s17_s19, 10   ;;  %s947_s12 = smov %s670_s13 }
 0x298   : > { %s948_s13 = smov %s674_s14  ;;  %s949_s14 = smov %s835_s5 }
 0x299   : > { %s950_s15 = smov %s686_s17  ;;  %s951_s16 = smov %s690_s18 }
 0x29a   : > { %s952_s17 = smov %s946_s11  ;;  %s953_s18 = smov %s959_s20 }
 0x29b   :  { %16 = sbr.rel (!%p14_p10) target bundleno = 8 (0x8), region = 85 }
 0x2a2   :  { %368 = vsyncpa [#allocation4], 1 }
 0x2a3   :  { %370 = vsyncpa [#allocation4 + $0x1], 1 }
 0x2a4   :  { %371 = vsyncpa [#allocation6], 1 }

</bundles_post_ra>
